<compile_context>
chip_gen: v7x
topology: tpu7x:2x2x1
jax: 0.10.0
libtpu: 0.0.40
codegen_flags: <defaults>
</compile_context>

<pallas_src>
import functools

import jax
import jax.numpy as jnp
from jax.experimental import pallas as pl
from jax.experimental.pallas import tpu as pltpu


def _prod(xs):
    p = 1
    for s in xs:
        p *= int(s)
    return p


def _static_pow(x, gamma):
    """x ** gamma for static python gamma; integer gamma -> repeated multiply."""
    g = float(gamma)
    if g < 0.0:
        raise ValueError(f"focal loss expects gamma >= 0, got {g}")
    gi = int(g)
    if g == gi and gi <= 8:
        if gi == 0:
            return jnp.ones_like(x)
        r = x
        for _ in range(gi - 1):
            r = r * x
        return r
    # non-integer gamma > 0: clamp base away from 0 to avoid NaN from round-off
    safe = jnp.maximum(x, 1e-30)
    return jnp.where(x > 0.0, jnp.exp(g * jnp.log(safe)), jnp.zeros_like(x))


def _focal_pointwise(x, t, fac, gamma):
    """Per-tile focal math.

    x:   (NB, C, TL) f32 logits (class axis on sublanes, spatial on lanes)
    t:   (NB, 1, TL) i32 target class per spatial position
    fac: (1,  C, 1)  f32 combined alpha/weight per-class factor
    Returns loss_t (NB, 1, TL) = focal loss at the target class, and one_hot.
    Note: out-of-range targets (t < 0 or t >= C) yield zero loss (silently),
    a property of the one-hot gather formulation.
    """
    xmax = jnp.max(x, axis=1, keepdims=True)                         # (NB,1,TL)
    lse = jnp.log(jnp.sum(jnp.exp(x - xmax), axis=1, keepdims=True)) + xmax

    cls = jax.lax.broadcasted_iota(jnp.int32, x.shape, 1)
    one_hot = (cls == t).astype(jnp.float32)                          # (NB,C,TL)

    # gather-first: never materialize the full log-softmax tensor
    x_t = jnp.sum(x * one_hot, axis=1, keepdims=True)                 # (NB,1,TL)
    fac_t = jnp.sum(fac * one_hot, axis=1, keepdims=True)             # (NB,1,TL)
    logp_t = x_t - lse
    p_t = jnp.exp(logp_t)
    one_minus = jnp.maximum(1.0 - p_t, 0.0)
    loss_t = -(_static_pow(one_minus, gamma) * logp_t * fac_t)        # (NB,1,TL)
    return loss_t, one_hot


def _focal_none_kernel(x_ref, t_ref, fac_ref, o_ref, *, gamma):
    x = x_ref[...].astype(jnp.float32)
    t = t_ref[...].astype(jnp.int32)
    loss_t, one_hot = _focal_pointwise(x, t, fac_ref[...], gamma)
    # Scatter back to the target class.  Boundary blocks: out-of-bounds lanes
    # are simply not written back by the pipeline, so no mask is needed here.
    o_ref[...] = (loss_t * one_hot).astype(o_ref.dtype)


def _focal_reduce_kernel(x_ref, t_ref, fac_ref, o_ref, acc_ref, *,
                         gamma, tl, l_valid):
    l = pl.program_id(1)

    @pl.when(l == 0)
    def _():
        acc_ref[...] = jnp.zeros_like(acc_ref)

    x = x_ref[...].astype(jnp.float32)
    t = t_ref[...].astype(jnp.int32)
    loss_t, _ = _focal_pointwise(x, t, fac_ref[...], gamma)

    # mask spatial lanes past L on the boundary block (no XLA-side padding)
    lane = l * tl + jax.lax.broadcasted_iota(jnp.int32, loss_t.shape, 2)
    acc_ref[...] += jnp.where(lane < l_valid, loss_t, 0.0)    # pure VPU add

    @pl.when(l == pl.num_programs(1) - 1)
    def _():
        # one cross-lane reduction per batch block, outside the hot loop;
        # broadcast the partial sum across the 128-lane output row.
        o_ref[...] = jnp.zeros_like(o_ref) + jnp.sum(acc_ref[...])


def _class_factors(alpha, weight, C):
    fac = jnp.ones((C,), jnp.float32)
    if alpha is not None:
        fac = fac * jnp.concatenate(
            [jnp.array([1.0 - float(alpha)], jnp.float32),
             jnp.full((C - 1,), float(alpha), jnp.float32)])
    if weight is not None:
        fac = fac * jnp.asarray(weight, jnp.float32).reshape(C)
    return fac.reshape(1, C, 1)


def _pick_tiles(N, C, L, itemsize, block_l, block_n):
    """Byte-budget tile heuristic, VMEM-capacity aware (v7x has 64 MiB)."""
    try:
        vmem_cap = int(pltpu.get_tpu_info().vmem_capacity_bytes)
    except Exception:
        vmem_cap = 64 << 20                     # be conservative (v7x-sized)
    big_vmem = vmem_cap >= (100 << 20)          # v5e / v6e: 128 MiB physical
    # Target ~2-3 MiB of logits DMA per grid step, capped so the in-kernel f32
    # temporaries (~4x C*TL words) plus double-buffered tiles fit scoped VMEM.
    byte_target = (3 << 20) if big_vmem else (2 << 20)
    elem_cap = (768 * 1024) if big_vmem else (512 * 1024)
    budget = max(128 * C, min(byte_target // max(1, itemsize), elem_cap))
    vmem_limit = (64 << 20) if big_vmem else (32 << 20)

    tl_budget = budget // C if block_l is None else int(block_l)
    if tl_budget >= L:
        tl = L                                  # full spatial extent per block
    else:
        tl = max(128, (tl_budget // 128) * 128)  # lane-aligned partial tiles

    if block_n is None:
        nb = max(1, min(N, budget // max(1, C * L))) if tl >= L else 1
    else:
        nb = max(1, min(N, int(block_n)))
    while N % nb != 0:                          # avoid partial batch blocks
        nb -= 1
    return nb, tl, vmem_limit


def focal_loss_pallas(pred, target, alpha, gamma=2.0, reduction="none",
                      weight=None, block_l=None, block_n=None):
    """Pallas TPU implementation of kornia-style focal_loss (forward)."""
    N, C = int(pred.shape[0]), int(pred.shape[1])
    spatial = tuple(int(s) for s in pred.shape[2:])
    L = _prod(spatial) if spatial else 1

    x = pred.reshape(N, C, L)                    # free reshape, no transpose
    if C <= 127:
        tgt_dtype = jnp.int8                     # shrink target DMA traffic
    elif C <= 32767:
        tgt_dtype = jnp.int16
    else:
        tgt_dtype = jnp.int32
    t = target.reshape(N, 1, L).astype(tgt_dtype)
    fac = _class_factors(alpha, weight, C)

    nb, tl, vmem_limit = _pick_tiles(N, C, L, pred.dtype.itemsize,
                                     block_l, block_n)
    grid = (N // nb, pl.cdiv(L, tl))

    in_specs = [
        pl.BlockSpec((nb, C, tl), lambda n, l: (n, 0, l)),   # logits tile
        pl.BlockSpec((nb, 1, tl), lambda n, l: (n, 0, l)),   # targets (lane-dense)
        pl.BlockSpec((1, C, 1), lambda n, l: (0, 0, 0)),     # class factors (resident)
    ]

    if reduction == "none":
        out = pl.pallas_call(
            functools.partial(_focal_none_kernel, gamma=gamma),
            grid=grid,
            in_specs=in_specs,
            out_specs=pl.BlockSpec((nb, C, tl), lambda n, l: (n, 0, l)),
            out_shape=jax.ShapeDtypeStruct((N, C, L), pred.dtype),
            compiler_params=pltpu.CompilerParams(
                dimension_semantics=("parallel", "parallel"),
                vmem_limit_bytes=vmem_limit),
        )(x, t, fac)
        return out.reshape((N, C) + spatial)

    elif reduction in ("mean", "sum"):
        # Per-batch-block partial sums; the batch grid axis is "parallel" so
        # v7x's two TensorCores both contribute.  Tiny final sum in wrapper.
        partials = pl.pallas_call(
            functools.partial(_focal_reduce_kernel, gamma=gamma, tl=tl,
                              l_valid=L),
            grid=grid,
            in_specs=in_specs,
            out_specs=pl.BlockSpec((1, 1, 128), lambda n, l: (n, 0, 0)),
            out_shape=jax.ShapeDtypeStruct((N // nb, 1, 128), jnp.float32),
            scratch_shapes=[pltpu.VMEM((nb, 1, tl), jnp.float32)],
            compiler_params=pltpu.CompilerParams(
                dimension_semantics=("parallel", "arbitrary"),
                vmem_limit_bytes=vmem_limit),
        )(x, t, fac)
        total = jnp.sum(partials[:, 0, 0])
        if reduction == "mean":
            # torch.mean over the (N, C, *) loss tensor -> divide by N*C*L
            total = total / (float(N) * float(C) * float(L))
        return total.astype(pred.dtype)

    else:
        raise NotImplementedError(f"Invalid reduction mode: {reduction}")


class FocalLoss:
    """Mirror of the PyTorch nn.Module FocalLoss (forward only)."""
    # TODO(synk): backward/autograd (the docstring example calls .backward())
    # is not implemented; forward pass only.

    def __init__(self, alpha, gamma=2.0, reduction="none", weight=None):
        self.alpha = alpha
        self.gamma = gamma
        self.reduction = reduction
        self.weight = weight

    def __call__(self, pred, target):
        return focal_loss_pallas(pred, target, self.alpha, self.gamma,
                                 self.reduction, self.weight)


# ---- pure-JAX reference for checking --------------------------------------
def _focal_loss_ref(pred, target, alpha, gamma=2.0, reduction="none",
                    weight=None):
    C = pred.shape[1]
    pred = pred.astype(jnp.float32)
    logp = jax.nn.log_softmax(pred, axis=1)
    p = jnp.exp(logp)
    oh = jax.nn.one_hot(target, C, axis=1, dtype=pred.dtype)
    loss = -jnp.power(1.0 - p, gamma) * logp * oh
    bshape = [1, C] + [1] * (pred.ndim - 2)
    if alpha is not None:
        fac = jnp.concatenate([jnp.array([1.0 - alpha], pred.dtype),
                               jnp.full((C - 1,), alpha, pred.dtype)])
        loss = fac.reshape(bshape) * loss
    if weight is not None:
        loss = jnp.asarray(weight, pred.dtype).reshape(bshape) * loss
    if reduction == "none":
        return loss
    if reduction == "mean":
        return jnp.mean(loss)
    return jnp.sum(loss)


if __name__ == "__main__":
    key = jax.random.PRNGKey(0)
    ks = jax.random.split(key, 8)

    # primary example: lane-exact spatial (L = 8*16 = 128)
    N, C, H, W = 2, 5, 8, 16
    pred = jax.random.normal(ks[0], (N, C, H, W), dtype=jnp.float32)
    target = jax.random.randint(ks[1], (N, H, W), 0, C, dtype=jnp.int32)

    # 'mean' reduction (docstring kwargs)
    out_mean = FocalLoss(alpha=0.5, gamma=2.0, reduction="mean")(pred, target)
    jax.block_until_ready(out_mean)
    ref_mean = _focal_loss_ref(pred, target, 0.5, 2.0, "mean")
    assert abs(float(out_mean) - float(ref_mean)) < 1e-5, (out_mean, ref_mean)

    # 'none' reduction (module default)
    out_none = FocalLoss(alpha=0.5, gamma=2.0, reduction="none")(pred, target)
    jax.block_until_ready(out_none)
    ref_none = _focal_loss_ref(pred, target, 0.5, 2.0, "none")
    assert out_none.shape == (N, C, H, W)
    assert float(jnp.max(jnp.abs(out_none - ref_none))) < 1e-5

    # 'sum' reduction with per-class weights
    wvec = jnp.array([1.0, 2.0, 0.5, 1.5, 1.0], jnp.float32)
    out_sum = FocalLoss(alpha=0.25, gamma=2.0, reduction="sum",
                        weight=wvec)(pred, target)
    jax.block_until_ready(out_sum)
    ref_sum = _focal_loss_ref(pred, target, 0.25, 2.0, "sum", wvec)
    assert abs(float(out_sum) - float(ref_sum)) < 1e-4 + 1e-5 * abs(float(ref_sum))

    # bf16 inputs (native-dtype DMA, f32 compute in-kernel)
    out_bf16 = FocalLoss(alpha=0.5, gamma=2.0, reduction="mean")(
        pred.astype(jnp.bfloat16), target)
    jax.block_until_ready(out_bf16)
    assert abs(float(out_bf16) - float(ref_mean)) < 5e-2

    # kornia docstring shape (1, 5, 3, 5): odd spatial extent (tl = L = 15)
    pred_d = jax.random.normal(ks[2], (1, C, 3, 5), dtype=jnp.float32)
    target_d = jax.random.randint(ks[3], (1, 3, 5), 0, C, dtype=jnp.int32)
    out_d = FocalLoss(alpha=0.5, gamma=2.0, reduction="mean")(pred_d, target_d)
    jax.block_until_ready(out_d)
    ref_d = _focal_loss_ref(pred_d, target_d, 0.5, 2.0, "mean")
    assert abs(float(out_d) - float(ref_d)) < 1e-5

    # force a multi-tile grid: batch tiling (nb=2) + several lane tiles (L=384)
    pred_t = jax.random.normal(ks[4], (4, C, 8, 48), dtype=jnp.float32)
    target_t = jax.random.randint(ks[5], (4, 8, 48), 0, C, dtype=jnp.int32)
    out_t_none = focal_loss_pallas(pred_t, target_t, 0.5, 2.0, "none",
                                   block_l=128, block_n=2)
    out_t_mean = focal_loss_pallas(pred_t, target_t, 0.5, 2.0, "mean",
                                   block_l=128, block_n=2)
    jax.block_until_ready((out_t_none, out_t_mean))
    ref_t_none = _focal_loss_ref(pred_t, target_t, 0.5, 2.0, "none")
    ref_t_mean = _focal_loss_ref(pred_t, target_t, 0.5, 2.0, "mean")
    assert float(jnp.max(jnp.abs(out_t_none - ref_t_none))) < 1e-5
    assert abs(float(out_t_mean) - float(ref_t_mean)) < 1e-5

    # non-128-aligned spatial extent with partial boundary tiles (L = 300)
    pred_u = jax.random.normal(ks[6], (2, 3, 10, 30), dtype=jnp.float32)
    target_u = jax.random.randint(ks[7], (2, 10, 30), 0, 3, dtype=jnp.int32)
    out_u_none = focal_loss_pallas(pred_u, target_u, 0.5, 2.0, "none",
                                   block_l=128)
    out_u_sum = focal_loss_pallas(pred_u, target_u, 0.5, 2.0, "sum",
                                  block_l=128)
    jax.block_until_ready((out_u_none, out_u_sum))
    ref_u_none = _focal_loss_ref(pred_u, target_u, 0.5, 2.0, "none")
    ref_u_sum = _focal_loss_ref(pred_u, target_u, 0.5, 2.0, "sum")
    assert float(jnp.max(jnp.abs(out_u_none - ref_u_none))) < 1e-5
    assert abs(float(out_u_sum) - float(ref_u_sum)) < 1e-4 + 1e-5 * abs(float(ref_u_sum))

    print("KERNEL_OK")
</pallas_src>

<mosaic_0001>
module attributes {stable_mosaic.version = 11 : i64} {
  func.func @_focal_reduce_kernel(%arg0: i32, %arg1: i32, %arg2: memref<2x5x128xf32, #tpu.memory_space<vmem>>, %arg3: memref<2x1x128xi8, #tpu.memory_space<vmem>>, %arg4: memref<1x5x1xf32, #tpu.memory_space<vmem>>, %arg5: memref<1x1x128xf32, #tpu.memory_space<vmem>>, %arg6: memref<2x1x128xf32, #tpu.memory_space<vmem>>) attributes {dimension_semantics = [#tpu.dimension_semantics<parallel>, #tpu.dimension_semantics<arbitrary>], iteration_bounds = array<i64: 1, 1>, scalar_prefetch = 0 : i64, scratch_operands = 1 : i64, tpu.core_type = #tpu.core_type<tc>, window_params = [{transform_indices = @transform_0, window_bounds = array<i64: 2, 5, 128>}, {transform_indices = @transform_1, window_bounds = array<i64: 2, 1, 128>}, {pipeline_mode = #tpu.pipeline_mode<synchronous>, transform_indices = @transform_2, window_bounds = array<i64: 1, 5, 1>}, {transform_indices = @transform_3, window_bounds = array<i64: 1, 1, 128>}]} {
    %c0_i32 = arith.constant 0 : i32
    %0 = arith.cmpi eq, %arg1, %c0_i32 : i32
    %1 = arith.extui %0 : i1 to i32
    %c0_i32_0 = arith.constant 0 : i32
    %2 = arith.cmpi ne, %1, %c0_i32_0 : i32
    scf.if %2 {
      %cst_25 = arith.constant 0.000000e+00 : f32
      %53 = vector.broadcast %cst_25 : f32 to vector<2x1x128xf32>
      %c0_26 = arith.constant 0 : index
      %c0_27 = arith.constant 0 : index
      %c0_28 = arith.constant 0 : index
      %54 = vector.load %arg6[%c0_26, %c0_27, %c0_28] : memref<2x1x128xf32, #tpu.memory_space<vmem>>, vector<2x1x128xf32>
      tpu.vector_store %arg6[%c0_26, %c0_27, %c0_28], %53 {strides = array<i32>} : memref<2x1x128xf32, #tpu.memory_space<vmem>>, vector<2x1x128xf32>,
    } else {
    }
    %c0 = arith.constant 0 : index
    %c0_1 = arith.constant 0 : index
    %c0_2 = arith.constant 0 : index
    %3 = vector.load %arg2[%c0, %c0_1, %c0_2] : memref<2x5x128xf32, #tpu.memory_space<vmem>>, vector<2x5x128xf32>
    %c0_3 = arith.constant 0 : index
    %c0_4 = arith.constant 0 : index
    %c0_5 = arith.constant 0 : index
    %4 = vector.load %arg3[%c0_3, %c0_4, %c0_5] : memref<2x1x128xi8, #tpu.memory_space<vmem>>, vector<2x1x128xi8>
    %5 = arith.extsi %4 : vector<2x1x128xi8> to vector<2x1x128xi32>
    %c0_6 = arith.constant 0 : index
    %c0_7 = arith.constant 0 : index
    %c0_8 = arith.constant 0 : index
    %6 = vector.load %arg4[%c0_6, %c0_7, %c0_8] : memref<1x5x1xf32, #tpu.memory_space<vmem>>, vector<1x5x1xf32>
    %cst = arith.constant dense<0xFF800000> : vector<2x128xf32>
    %7 = vector.multi_reduction <maximumf>, %3, %cst [1] : vector<2x5x128xf32> to vector<2x128xf32>
    %8 = vector.shape_cast %7 : vector<2x128xf32> to vector<2x1x128xf32>
    %9 = vector.broadcast %8 : vector<2x1x128xf32> to vector<2x5x128xf32>
    %10 = arith.subf %3, %9 : vector<2x5x128xf32>
    %11 = math.exp %10 : vector<2x5x128xf32>
    %cst_9 = arith.constant dense<0.000000e+00> : vector<2x128xf32>
    %12 = vector.multi_reduction <add>, %11, %cst_9 [1] : vector<2x5x128xf32> to vector<2x128xf32>
    %13 = vector.shape_cast %12 : vector<2x128xf32> to vector<2x1x128xf32>
    %14 = math.log %13 : vector<2x1x128xf32>
    %15 = arith.addf %14, %8 : vector<2x1x128xf32>
    %16 = tpu.iota {dimensions = array<i32: 1>} : vector<2x5x128xi32>
    %17 = vector.broadcast %5 : vector<2x1x128xi32> to vector<2x5x128xi32>
    %18 = arith.cmpi eq, %16, %17 : vector<2x5x128xi32>
    %19 = arith.extui %18 : vector<2x5x128xi1> to vector<2x5x128xi32>
    %20 = arith.sitofp %19 : vector<2x5x128xi32> to vector<2x5x128xf32>
    %21 = arith.mulf %3, %20 : vector<2x5x128xf32>
    %cst_10 = arith.constant dense<0.000000e+00> : vector<2x128xf32>
    %22 = vector.multi_reduction <add>, %21, %cst_10 [1] : vector<2x5x128xf32> to vector<2x128xf32>
    %23 = vector.shape_cast %22 : vector<2x128xf32> to vector<2x1x128xf32>
    %24 = vector.broadcast %6 : vector<1x5x1xf32> to vector<2x5x128xf32>
    %25 = arith.mulf %24, %20 : vector<2x5x128xf32>
    %cst_11 = arith.constant dense<0.000000e+00> : vector<2x128xf32>
    %26 = vector.multi_reduction <add>, %25, %cst_11 [1] : vector<2x5x128xf32> to vector<2x128xf32>
    %27 = vector.shape_cast %26 : vector<2x128xf32> to vector<2x1x128xf32>
    %28 = arith.subf %23, %15 : vector<2x1x128xf32>
    %29 = math.exp %28 : vector<2x1x128xf32>
    %cst_12 = arith.constant 1.000000e+00 : f32
    %30 = vector.broadcast %cst_12 : f32 to vector<2x1x128xf32>
    %31 = arith.subf %30, %29 : vector<2x1x128xf32>
    %cst_13 = arith.constant 0.000000e+00 : f32
    %32 = vector.broadcast %cst_13 : f32 to vector<2x1x128xf32>
    %33 = arith.maximumf %31, %32 : vector<2x1x128xf32>
    %34 = arith.mulf %33, %33 : vector<2x1x128xf32>
    %35 = arith.mulf %34, %28 : vector<2x1x128xf32>
    %36 = arith.mulf %35, %27 : vector<2x1x128xf32>
    %cst_14 = arith.constant 0.000000e+00 : f32
    %37 = vector.broadcast %cst_14 : f32 to vector<2x1x128xf32>
    %38 = arith.subf %37, %36 : vector<2x1x128xf32>
    %c128_i32 = arith.constant 128 : i32
    %39 = arith.muli %arg1, %c128_i32 : i32
    %40 = tpu.iota {dimensions = array<i32: 2>} : vector<2x1x128xi32>
    %41 = vector.broadcast %39 : i32 to vector<2x1x128xi32>
    %42 = arith.addi %41, %40 : vector<2x1x128xi32>
    %c0_15 = arith.constant 0 : index
    %c0_16 = arith.constant 0 : index
    %c0_17 = arith.constant 0 : index
    %43 = vector.load %arg6[%c0_15, %c0_16, %c0_17] : memref<2x1x128xf32, #tpu.memory_space<vmem>>, vector<2x1x128xf32>
    %c128_i32_18 = arith.constant 128 : i32
    %44 = vector.broadcast %c128_i32_18 : i32 to vector<2x1x128xi32>
    %45 = arith.cmpi slt, %42, %44 : vector<2x1x128xi32>
    %cst_19 = arith.constant 0.000000e+00 : f32
    %46 = vector.broadcast %cst_19 : f32 to vector<2x1x128xf32>
    %47 = arith.select %45, %38, %46 : vector<2x1x128xi1>, vector<2x1x128xf32>
    %48 = arith.addf %43, %47 : vector<2x1x128xf32>
    %c0_20 = arith.constant 0 : index
    %c0_21 = arith.constant 0 : index
    %c0_22 = arith.constant 0 : index
    %49 = vector.load %arg6[%c0_20, %c0_21, %c0_22] : memref<2x1x128xf32, #tpu.memory_space<vmem>>, vector<2x1x128xf32>
    tpu.vector_store %arg6[%c0_20, %c0_21, %c0_22], %48 {strides = array<i32>} : memref<2x1x128xf32, #tpu.memory_space<vmem>>, vector<2x1x128xf32>,
    %c0_i32_23 = arith.constant 0 : i32
    %50 = arith.cmpi eq, %arg1, %c0_i32_23 : i32
    %51 = arith.extui %50 : i1 to i32
    %c0_i32_24 = arith.constant 0 : i32
    %52 = arith.cmpi ne, %51, %c0_i32_24 : i32
    scf.if %52 {
      %cst_25 = arith.constant 0.000000e+00 : f32
      %53 = vector.broadcast %cst_25 : f32 to vector<1x1x128xf32>
      %c0_26 = arith.constant 0 : index
      %c0_27 = arith.constant 0 : index
      %c0_28 = arith.constant 0 : index
      %54 = vector.load %arg6[%c0_26, %c0_27, %c0_28] : memref<2x1x128xf32, #tpu.memory_space<vmem>>, vector<2x1x128xf32>
      %55 = vector.shape_cast %54 : vector<2x1x128xf32> to vector<1x2x1x128xf32>
      %cst_29 = arith.constant dense<0.000000e+00> : vector<1xf32>
      %56 = vector.multi_reduction <add>, %55, %cst_29 [1, 2, 3] : vector<1x2x1x128xf32> to vector<1xf32>
      %57 = vector.shape_cast %56 : vector<1xf32> to vector<1x1x1x1xf32>
      %58 = vector.extract %57[0, 0, 0, 0] : f32 from vector<1x1x1x1xf32>
      %59 = vector.broadcast %58 : f32 to vector<1x1x128xf32>
      %60 = arith.addf %53, %59 : vector<1x1x128xf32>
      %c0_30 = arith.constant 0 : index
      %c0_31 = arith.constant 0 : index
      %c0_32 = arith.constant 0 : index
      %61 = vector.load %arg5[%c0_30, %c0_31, %c0_32] : memref<1x1x128xf32, #tpu.memory_space<vmem>>, vector<1x1x128xf32>
      tpu.vector_store %arg5[%c0_30, %c0_31, %c0_32], %60 {strides = array<i32>} : memref<1x1x128xf32, #tpu.memory_space<vmem>>, vector<1x1x128xf32>,
    } else {
    }
    return
  }
  func.func @transform_0(%arg0: i32, %arg1: i32) -> (i32, i32, i32) {
    %c0_i32 = arith.constant 0 : i32
    %c0_i32_0 = arith.constant 0 : i32
    return %arg0, %c0_i32, %arg1 : i32, i32, i32
  }
  func.func @transform_1(%arg0: i32, %arg1: i32) -> (i32, i32, i32) {
    %c0_i32 = arith.constant 0 : i32
    %c0_i32_0 = arith.constant 0 : i32
    return %arg0, %c0_i32, %arg1 : i32, i32, i32
  }
  func.func @transform_2(%arg0: i32, %arg1: i32) -> (i32, i32, i32) {
    %c0_i32 = arith.constant 0 : i32
    %c0_i32_0 = arith.constant 0 : i32
    %c0_i32_1 = arith.constant 0 : i32
    %c0_i32_2 = arith.constant 0 : i32
    return %c0_i32, %c0_i32_0, %c0_i32_1 : i32, i32, i32
  }
  func.func @transform_3(%arg0: i32, %arg1: i32) -> (i32, i32, i32) {
    %c0_i32 = arith.constant 0 : i32
    %c0_i32_0 = arith.constant 0 : i32
    %c0_i32_1 = arith.constant 0 : i32
    return %arg0, %c0_i32, %c0_i32_0 : i32, i32, i32
  }
}

</mosaic_0001>

<bundles_post_ra>
// kernel: tpu_custom_call.1
= control target key start
LH: loop header
LB: loop body
LE: loop exit
PB: predicated region body
PF: predicated region fallthrough
CT: control target
= control target key end

     0   :  { %v233_v1 = vmov 0   ;;  %v234_v2 = vmov 0.0   ;;  %s291_s0 = inlined_call_operand.vmem [shape: f32[2,5,128], index: 0, kind: input, shape index: {}]   ;;  %s292_s1 = inlined_call_operand.vmem [shape: s8[2,1,128], index: 1, kind: input, shape index: {}]   ;;  %s293_s2 = inlined_call_operand.vmem [shape: f32[1,5,1], index: 2, kind: input, shape index: {}]   ;;  %s294_s3 = inlined_call_operand.hbm [shape: f32[1,1,128], index: 3, kind: output, shape index: {}]  }
   0x1   :  { %v27_v0 = vld [vmem:[%s293_s2] sm:$0x1f]  ;;  %196 = vset.pattern.permute.xlu0 %v233_v1  ;;  %19 = vst [vmem:[#allocation2] sm:$0x1] %v234_v2  ;;  %20 = vst [vmem:[#allocation2 + $0x1] sm:$0x1] %v234_v2 }
   0x2   :  { %103 = vperm.xlu0 %196, %v27_v0  }
   0x3   :  { %8 = vsyncpa [#allocation4], 0  ;;  %vm28_vm0 = vcmask 1044480   ;;  %v21_v3 = vld [vmem:[%s291_s0] sm:$0x1f]  ;;  %v69_v23 = vlaneseq  ;;  %vm159_vm3 = vcmask 1040384  }
   0x4   :  { %v22_v4 = vld [vmem:[%s291_s0 + $0x8] sm:$0x1f]  ;;  %v29_v5 = vsel %vm28_vm0, %v21_v3, -inf  ;;  %v23_v27 = vld [vmem:[%s292_s1] sm:$0x1] }
   0x5   :  { %v36_v6 = vsel %vm28_vm0, %v22_v4, -inf  ;;  %v30_v7 = vrot.slane %v29_v5, 4  ;;  %v70_v26 = vshrl.u32 %v69_v23, 7  ;;  %v24_v29 = vld [vmem:[%s292_s1 + $0x1] sm:$0x1]  ;;  %v25_v32 = vunpack.c.0.s8 %v23_v27  ;;  %s235_s1 = smov [#allocation3]  }
   0x6   :  { %v37_v8 = vrot.slane %v36_v6, 4  ;;  %v26_v34 = vunpack.c.0.s8 %v24_v29  ;;  %s181_s20 = sshll.u32 %s235_s1, 4  ;;  %s182_s20 = int_to_ptr.vmem [resolvable:$true] %s181_s20 }
   0x7   :  { %v31_v9 = vmax.f32 %v29_v5, %v30_v7  ;;  %v73_v31 = vsub.s32 0, %v70_v26  ;;  %s209_s22 = scalar_lea.vmem %s182_s20, 16  ;;  %s213_s23 = scalar_lea.vmem %s182_s20, 32 }
   0x8   :  { %v38_v10 = vmax.f32 %v36_v6, %v37_v8  ;;  %p210_p0 = scmp.ne.s32.totalorder %s182_s20, %s209_s22  ;;  %p214_p1 = scmp.lt.s32.totalorder %s182_s20, %s182_s20 }
   0x9   :  { %v32_v11 = vrot.slane %v31_v9, 2  ;;  %v74_v37 = vrot.slane %v25_v32, %v73_v31  ;;  %v78_v39 = vrot.slane %v26_v34, %v73_v31  ;;  %p215_p2 = scmp.lt.s32.totalorder %s213_s23, %s209_s22 }
   0xa   :  { %v39_v12 = vrot.slane %v38_v10, 2 }
   0xb   :  { %v33_v13 = vmax.f32 %v31_v9, %v32_v11  ;;  %vm79_vm1 = vcmp.eq.s32.totalorder %v70_v26, %v74_v37  ;;  %vm80_vm2 = vcmp.eq.s32.totalorder %v70_v26, %v78_v39  ;;  %p216_p3 = por %p215_p2, %p214_p1 }
   0xc   :  { %v40_v14 = vmax.f32 %v38_v10, %v39_v12  ;;  %v189_v42 = vsel %vm79_vm1, 1.0, %v234_v2  ;;  %v190_v44 = vsel %vm80_vm2, 1.0, %v234_v2 }
   0xd   :  { %v34_v15 = vrot.slane %v33_v13, 1  ;;  %v85_v46 = vmul.f32 %v189_v42, %v21_v3  ;;  %v86_v47 = vmul.f32 %v190_v44, %v22_v4  ;;  %p217_p4 = pnand %p216_p3, %p210_p0 }
   0xe   :  { %v41_v16 = vrot.slane %v40_v14, 1 }
   0xf   :  { %v35_v17 = vmax.f32 %v33_v13, %v34_v15  ;;  %v87_v50 = vsel %vm28_vm0, %v85_v46, 0.0  ;;  %v94_v51 = vsel %vm28_vm0, %v86_v47, 0.0 }
  0x10   :  { %v42_v18 = vmax.f32 %v40_v14, %v41_v16  ;;  %v88_v54 = vrot.slane %v87_v50, 4  ;;  %v95_v55 = vrot.slane %v94_v51, 4 }
  0x11   :  { %v43_v19 = vsub.f32 %v21_v3, %v35_v17 }
  0x12   :  { %v44_v20 = vsub.f32 %v22_v4, %v42_v18  ;;  %v89_v56 = vadd.f32 %v88_v54, %v87_v50  ;;  %v96_v57 = vadd.f32 %v95_v55, %v94_v51 }
  0x13   :  { %v45_v21 = vmul.f32 1.442695, %v43_v19 }
  0x14   :  { %v47_v22 = vmul.f32 1.442695, %v44_v20  ;;  %v90_v58 = vrot.slane %v89_v56, 2  ;;  %v97_v59 = vrot.slane %v96_v57, 2 }
  0x15   :  { %197 = vpow2.f32 %v45_v21 }
  0x16   :  { %199 = vpow2.f32 %v47_v22  ;;  %v91_v60 = vadd.f32 %v90_v58, %v89_v56  ;;  %v98_v62 = vadd.f32 %v97_v59, %v96_v57 }
  0x18   :  { %v92_v1 = vrot.slane %v91_v60, 1  ;;  %v99_v3 = vrot.slane %v98_v62, 1 }
  0x1a   :  { %v93_v5 = vadd.f32 %v92_v1, %v91_v60  ;;  %v100_v7 = vadd.f32 %v99_v3, %v98_v62 }
  0x1f   :  { %v198_v24 = vpop.eup %197 }
  0x20   :  { %v200_v25 = vpop.eup %199  ;;  %v49_v28 = vsel %vm28_vm0, %v198_v24, 0.0 }
  0x21   :  { %v56_v30 = vsel %vm28_vm0, %v200_v25, 0.0  ;;  %v50_v33 = vrot.slane %v49_v28, 4 }
  0x22   :  { %v57_v35 = vrot.slane %v56_v30, 4 }
  0x23   :  { %v51_v36 = vadd.f32 %v50_v33, %v49_v28 }
  0x24   :  { %v58_v38 = vadd.f32 %v57_v35, %v56_v30 }
  0x25   :  { %v52_v40 = vrot.slane %v51_v36, 2 }
  0x26   :  { %v59_v41 = vrot.slane %v58_v38, 2 }
  0x27   :  { %v53_v43 = vadd.f32 %v52_v40, %v51_v36 }
  0x28   :  { %v60_v45 = vadd.f32 %v59_v41, %v58_v38  ;;  %v145_v41 = vld [vmem:[#allocation2] sm:$0x1] }
  0x29   :  { %v54_v48 = vrot.slane %v53_v43, 1 }
  0x2a   :  { %v61_v49 = vrot.slane %v60_v45, 1 }
  0x2b   :  { %v55_v52 = vadd.f32 %v54_v48, %v53_v43 }
  0x2c   :  { %v62_v53 = vadd.f32 %v61_v49, %v60_v45 }
  0x2d   :  { %201 = vlog2.f32 %v55_v52 }
  0x2e   :  { %203 = vlog2.f32 %v62_v53 }
  0x37   :  { %v202_v61 = vpop.eup %201 }
  0x38   :  { %v204_v63 = vpop.eup %203  ;;  %v64_v0 = vmul.f32 0.6931472, %v202_v61 }
  0x39   :  { %v66_v2 = vmul.f32 0.6931472, %v204_v63 }
  0x3a   :  { %v67_v4 = vadd.f32 %v64_v0, %v35_v17 }
  0x3b   :  { %v68_v6 = vadd.f32 %v66_v2, %v42_v18 }
  0x3c   :  { %v122_v8 = vsub.f32 %v93_v5, %v67_v4 }
  0x3d   :  { %v123_v9 = vsub.f32 %v100_v7, %v68_v6 }
  0x3e   :  { %v124_v10 = vmul.f32 1.442695, %v122_v8 }
  0x3f   :  { %v126_v11 = vmul.f32 1.442695, %v123_v9 }
  0x40   :  { %205 = vpow2.f32 %v124_v10 }
  0x41   :  { %207 = vpow2.f32 %v126_v11 }
  0x4a   :  { %v206_v12 = vpop.eup %205 }
  0x4b   :  { %v208_v13 = vpop.eup %207  ;;  %v128_v15 = vsub.f32 1.0, %v206_v12 }
  0x4c   :  { %v129_v16 = vsub.f32 1.0, %v208_v13 }
  0x4d   :  { %v130_v23 = vmax.f32 %v128_v15, 0.0 }
  0x4e   :  { %v131_v24 = vmax.f32 %v129_v16, 0.0 }
  0x4f   :  { %v132_v29 = vmul.f32 %v130_v23, %v130_v23 }
  0x50   :  { %v133_v30 = vmul.f32 %v131_v24, %v131_v24 }
  0x51   :  { %v134_v35 = vmul.f32 %v132_v29, %v122_v8 }
  0x52   :  { %v135_v36 = vmul.f32 %v133_v30, %v123_v9 }
  0x81   :  { %v104_v14 = vpop.permute.xlu0 %103 }
  0x82   :  { %v106_v19 = vmul.f32 %v189_v42, %v104_v14  ;;  %v107_v20 = vmul.f32 %v190_v44, %v104_v14  ;;  %v146_v42 = vld [vmem:[#allocation2 + $0x1] sm:$0x1] }
  0x84   :  { %v108_v21 = vsel %vm28_vm0, %v106_v19, 0.0  ;;  %v115_v17 = vsel %vm28_vm0, %v107_v20, 0.0 }
  0x85   :  { %v109_v22 = vrot.slane %v108_v21, 4  ;;  %v116_v18 = vrot.slane %v115_v17, 4 }
  0x87   :  { %v110_v25 = vadd.f32 %v109_v22, %v108_v21  ;;  %v117_v26 = vadd.f32 %v116_v18, %v115_v17 }
  0x89   :  { %v111_v27 = vrot.slane %v110_v25, 2  ;;  %v118_v28 = vrot.slane %v117_v26, 2 }
  0x8b   :  { %v112_v31 = vadd.f32 %v111_v27, %v110_v25  ;;  %v119_v32 = vadd.f32 %v118_v28, %v117_v26 }
  0x8d   :  { %v113_v33 = vrot.slane %v112_v31, 1  ;;  %v120_v34 = vrot.slane %v119_v32, 1 }
  0x8f   :  { %v114_v37 = vadd.f32 %v113_v33, %v112_v31  ;;  %v121_v38 = vadd.f32 %v120_v34, %v119_v32 }
  0x91   :  { %v136_v39 = vmul.f32 %v134_v35, %v114_v37  ;;  %v137_v40 = vmul.f32 %v135_v36, %v121_v38 }
  0x93   :  { %v138_v43 = vsub.f32 0.0, %v136_v39  ;;  %v139_v44 = vsub.f32 0.0, %v137_v40 }
  0x95   :  { %v150_v45 = vadd.f32 %v145_v41, %v138_v43  ;;  %v151_v46 = vadd.f32 %v146_v42, %v139_v44 }
  0x97   :  { %152 = vst [vmem:[#allocation2] sm:$0x1] %v150_v45  ;;  %153 = vst [vmem:[#allocation2 + $0x1] sm:$0x1] %v151_v46 }
  0x9e   :  { %v157_v47 = vld [vmem:[#allocation2] sm:$0x1]  ;;  %v158_v48 = vld [vmem:[#allocation2 + $0x1] sm:$0x1] }
  0x9f   :  { %v160_v49 = vsel %vm159_vm3, %v157_v47, 0.0  ;;  %v161_v50 = vsel %vm159_vm3, %v158_v48, 0.0 }
  0xa0   :  { %v162_v51 = vadd.f32 %v161_v50, %v160_v49 }
  0xa2   :  { %163 = vadd.xlane.f32.xlu0 %v162_v51 }
 0x12f   :  { %v164_v52 = vpop.xlane.xlu0 %163 }
 0x130   :  { %v165_v53 = vrot.slane %v164_v52, 4 }
 0x132   :  { %v166_v54 = vadd.f32 %v165_v53, %v164_v52 }
 0x134   :  { %v167_v55 = vrot.slane %v166_v54, 2 }
 0x136   :  { %v168_v56 = vadd.f32 %v167_v55, %v166_v54 }
 0x138   :  { %v169_v57 = vrot.slane %v168_v56, 1 }
 0x13a   :  { %v170_v58 = vadd.f32 %v169_v57, %v168_v56 }
 0x13c   :  { %191 = vpush %v170_v58 }
 0x16d   :  { %s192_s21 = spop %191 }
 0x16e   :  { %v172_v59 = vstv %s192_s21 }
 0x16f   :  { %174 = vst [vmem:[#allocation3] sm:$0x1] %v172_v59 }
 0x170   :  { %220 = shalt.err (!%p217_p4)
}
 0x171   :  { %s221_s26 = scalar_lea.hbm %s294_s3, 16 }
 0x172   :  { %p222_p5 = scmp.ne.s32.totalorder %s294_s3, %s221_s26  ;;  %p225_p6 = scmp.lt.u32.totalorder %s221_s26, %s294_s3 }
 0x174   :  { %p227_p7 = pnand %p225_p6, %p222_p5 }
 0x176   :  { %230 = shalt.err (!%p227_p7)
}
 0x177   :  { %184 = dma.vmem_to_hbm [thread:$0]  %s182_s20, 16, %s294_s3, [#allocation4]  }
 0x178   :  { %231 = dma.done.wait [#allocation4], 16  }
 0x179   :  { %232 = vsyncadd [#allocation4], 4294967280 }
 0x17a   :  { %188 = vsyncpa [#allocation4], 1 }

</bundles_post_ra>
